<compile_context>
chip_gen: v6e
topology: v6e:2x2x1
jax: 0.10.0
libtpu: 0.0.40
codegen_flags: <defaults>
</compile_context>

<pallas_src>
import functools
import math

import jax
import jax.numpy as jnp
from jax.experimental import pallas as pl
from jax.experimental.pallas import tpu as pltpu


def _arcface_kernel(labels_ref, logits_ref, out_ref, *, s, cos_m, sin_m, tc):
    """One (tb, tc) tile of logits; labels_ref is the (tb, 1) label column."""
    j = pl.program_id(1)

    x = logits_ref[...].astype(jnp.float32)                # (tb, tc)
    labels = labels_ref[...]                                # (tb, 1) int32

    # Global class index of each lane in this tile.  For the padded tail block
    # col_ids >= C never equal a valid label, and padded rows are masked on
    # store, so out-of-range lanes are harmless.
    col_ids = jax.lax.broadcasted_iota(jnp.int32, x.shape, 1) + j * tc

    # One-hot target mask; rows with label == -1 get no margin.
    is_target = jnp.logical_and(col_ids == labels, labels != -1)

    # cos(arccos(x) + m) = x*cos(m) - sqrt(1 - x^2)*sin(m)
    # Clamp 1 - x^2 at 0 so fp-rounded |x| slightly > 1 cannot produce NaN.
    sin_theta = jnp.sqrt(jnp.maximum(jnp.float32(1.0) - x * x, jnp.float32(0.0)))
    target_val = x * jnp.float32(cos_m) - sin_theta * jnp.float32(sin_m)

    out = jnp.where(is_target, target_val, x) * jnp.float32(s)
    out_ref[...] = out.astype(out_ref.dtype)


def _round_up(x, m):
    return ((x + m - 1) // m) * m


def _device_tiling_defaults():
    """(tb_max, tc_max, vmem_limit_bytes) gated on the VMEM capacity."""
    try:
        vmem_cap = int(pltpu.get_tpu_info().vmem_capacity_bytes)
    except Exception:  # interpret mode / unknown chip: be conservative (v7x-safe)
        vmem_cap = 64 << 20
    if vmem_cap >= (96 << 20):       # v5e / v6e: 128 MiB VMEM
        return 256, 8192, 96 << 20   # 8 MiB f32 tiles, ~32 MiB double-buffered
    return 256, 4096, 48 << 20       # v7x: 64 MiB VMEM per TC -> keep 4 MiB tiles


def arcface_forward(logits, labels, *, s=64.0, margin=0.5,
                    tb=None, tc=None, out_dtype=None, alias_input=True):
    """Pallas forward of ArcFace(s, margin).forward(logits, labels).

    logits: [B, C] cosine similarities; labels: [B] int (-1 == "no positive").
    alias_input=True (default) mirrors PyTorch's in-place update; donate
    `logits` in the enclosing jit to actually reuse the buffer (otherwise XLA
    inserts a defensive copy and results are unchanged).
    out_dtype lets the caller down-cast the output (e.g. bfloat16) to cut HBM
    traffic on this memory-bound op; aliasing is disabled if it differs from
    the input dtype.
    """
    B, C = logits.shape
    out_dtype = logits.dtype if out_dtype is None else jnp.dtype(out_dtype)

    itemsize = jnp.dtype(logits.dtype).itemsize
    sub_align = max(8, 32 // max(itemsize, 1))   # 8 for f32, 16 for bf16, 32 for int8

    tb_max, tc_max, vmem_limit = _device_tiling_defaults()

    if tb is None:
        # tb_max (256) is a multiple of every sublane alignment; a full-B block
        # is always a legal block dim even when B is ragged.
        tb = B if B <= tb_max else tb_max
    if tc is None:
        tc = C if C <= tc_max else tc_max
        # Megacore (v7x has 2 TCs): make sure at least one "parallel" axis has
        # >= 2 blocks so one core is not left idle.
        if pl.cdiv(B, tb) == 1 and pl.cdiv(C, tc) == 1 and C > 128:
            tc = min(tc, _round_up(pl.cdiv(C, 2), 128))

    # Layout legality: block dims must be lane/sublane aligned OR cover the
    # full array dim.  Ragged tails (cdiv grid) are padded/masked by Pallas.
    assert tb == B or tb % sub_align == 0, "tb must be sublane-aligned or == B"
    assert tc == C or tc % 128 == 0, "tc must be a multiple of 128 or == C"

    labels2d = labels.reshape(B, 1).astype(jnp.int32)

    kernel = functools.partial(
        _arcface_kernel, s=float(s),
        cos_m=math.cos(margin), sin_m=math.sin(margin), tc=tc)

    alias = {1: 0} if (alias_input and out_dtype == logits.dtype) else {}

    return pl.pallas_call(
        kernel,
        out_shape=jax.ShapeDtypeStruct((B, C), out_dtype),
        grid_spec=pl.GridSpec(
            grid=(pl.cdiv(B, tb), pl.cdiv(C, tc)),
            in_specs=[
                pl.BlockSpec((tb, 1), lambda i, j: (i, 0)),    # labels column
                pl.BlockSpec((tb, tc), lambda i, j: (i, j)),   # logits tile
            ],
            out_specs=pl.BlockSpec((tb, tc), lambda i, j: (i, j)),
        ),
        compiler_params=pltpu.CompilerParams(
            dimension_semantics=("parallel", "parallel"),
            vmem_limit_bytes=vmem_limit),
        # In-place update (PyTorch arccos_/cos_ semantics); input 1 is
        # `logits`, output 0 is the result.
        input_output_aliases=alias,
    )(labels2d, logits)


def _reference(logits, labels, *, s, margin):
    """Pure-JAX reference mirroring the PyTorch forward (arccos/cos round trip)."""
    B, C = logits.shape
    one_hot = (jnp.arange(C)[None, :] == labels[:, None]) & (labels[:, None] != -1)
    theta = jnp.arccos(jnp.clip(logits, -1.0, 1.0))
    theta = theta + jnp.where(one_hot, margin, 0.0)
    return jnp.cos(theta) * s


if __name__ == "__main__":
    key = jax.random.PRNGKey(0)
    k_logit, k_label = jax.random.split(key)

    # ---- Test 1: small divisible shapes, default (auto) tiling ------------
    B, C = 32, 1024
    logits = jax.random.uniform(k_logit, (B, C), jnp.float32,
                                minval=-0.999, maxval=0.999)
    labels = jax.random.randint(k_label, (B,), 0, C, dtype=jnp.int32)
    labels = labels.at[3].set(-1)  # one "no positive" row (labels != -1 filter)

    ref = _reference(logits, labels, s=64.0, margin=0.5)
    out = jax.block_until_ready(arcface_forward(logits, labels, s=64.0, margin=0.5))
    assert out.shape == (B, C) and out.dtype == jnp.float32
    assert jnp.allclose(out, ref, atol=1e-3, rtol=1e-4), "mismatch vs reference"

    # ---- Test 2: ragged class count (partial tail block, masked stores) ---
    Br, Cr = 32, 1000
    logits_r = jax.random.uniform(jax.random.fold_in(k_logit, 1), (Br, Cr),
                                  jnp.float32, minval=-0.999, maxval=0.999)
    labels_r = jax.random.randint(jax.random.fold_in(k_label, 1), (Br,), 0, Cr,
                                  dtype=jnp.int32)
    labels_r = labels_r.at[0].set(-1)
    ref_r = _reference(logits_r, labels_r, s=64.0, margin=0.5)
    out_r = jax.block_until_ready(arcface_forward(logits_r, labels_r,
                                                  s=64.0, margin=0.5))
    assert jnp.allclose(out_r, ref_r, atol=1e-3, rtol=1e-4), \
        "mismatch vs reference (ragged C)"

    # ---- Test 3: explicit small tiles (multi-step grid + ragged tail) -----
    out_t = jax.block_until_ready(arcface_forward(logits_r, labels_r,
                                                  s=64.0, margin=0.5,
                                                  tb=8, tc=256))
    assert jnp.allclose(out_t, ref_r, atol=1e-3, rtol=1e-4), \
        "mismatch vs reference (tiled, ragged C)"

    # ---- Test 4: bfloat16 streaming I/O ------------------------------------
    logits_bf = logits.astype(jnp.bfloat16)
    ref_bf = _reference(logits_bf.astype(jnp.float32), labels, s=64.0, margin=0.5)
    out_bf = jax.block_until_ready(arcface_forward(logits_bf, labels,
                                                   s=64.0, margin=0.5))
    assert out_bf.dtype == jnp.bfloat16
    assert jnp.allclose(out_bf.astype(jnp.float32), ref_bf, atol=0.5, rtol=3e-2), \
        "mismatch vs reference (bf16)"

    print("KERNEL_OK")
</pallas_src>

<mosaic_0001>
module attributes {stable_mosaic.version = 11 : i64} {
  func.func @_arcface_kernel(%arg0: i32, %arg1: i32, %arg2: memref<32x1xi32, #tpu.memory_space<vmem>>, %arg3: memref<32x512xf32, #tpu.memory_space<vmem>>, %arg4: memref<32x512xf32, #tpu.memory_space<vmem>>) attributes {dimension_semantics = [#tpu.dimension_semantics<parallel>, #tpu.dimension_semantics<parallel>], iteration_bounds = array<i64: 1, 2>, scalar_prefetch = 0 : i64, scratch_operands = 0 : i64, tpu.core_type = #tpu.core_type<tc>, window_params = [{transform_indices = @transform_0, window_bounds = array<i64: 32, 1>}, {transform_indices = @transform_1, window_bounds = array<i64: 32, 512>}, {transform_indices = @transform_2, window_bounds = array<i64: 32, 512>}]} {
    %c0 = arith.constant 0 : index
    %c0_0 = arith.constant 0 : index
    %0 = vector.load %arg3[%c0, %c0_0] : memref<32x512xf32, #tpu.memory_space<vmem>>, vector<32x512xf32>
    %c0_1 = arith.constant 0 : index
    %c0_2 = arith.constant 0 : index
    %1 = vector.load %arg2[%c0_1, %c0_2] : memref<32x1xi32, #tpu.memory_space<vmem>>, vector<32x1xi32>
    %2 = tpu.iota {dimensions = array<i32: 1>} : vector<32x512xi32>
    %c512_i32 = arith.constant 512 : i32
    %3 = arith.muli %arg1, %c512_i32 : i32
    %4 = vector.broadcast %3 : i32 to vector<32x512xi32>
    %5 = arith.addi %2, %4 : vector<32x512xi32>
    %6 = vector.broadcast %1 : vector<32x1xi32> to vector<32x512xi32>
    %7 = arith.cmpi eq, %5, %6 : vector<32x512xi32>
    %c-1_i32 = arith.constant -1 : i32
    %8 = vector.broadcast %c-1_i32 : i32 to vector<32x1xi32>
    %9 = arith.cmpi ne, %1, %8 : vector<32x1xi32>
    %10 = vector.broadcast %9 : vector<32x1xi1> to vector<32x512xi1>
    %11 = arith.andi %7, %10 : vector<32x512xi1>
    %12 = arith.mulf %0, %0 : vector<32x512xf32>
    %cst = arith.constant 1.000000e+00 : f32
    %13 = vector.broadcast %cst : f32 to vector<32x512xf32>
    %14 = arith.subf %13, %12 : vector<32x512xf32>
    %cst_3 = arith.constant 0.000000e+00 : f32
    %15 = vector.broadcast %cst_3 : f32 to vector<32x512xf32>
    %16 = arith.maximumf %14, %15 : vector<32x512xf32>
    %17 = math.sqrt %16 : vector<32x512xf32>
    %cst_4 = arith.constant 0.87758255 : f32
    %18 = vector.broadcast %cst_4 : f32 to vector<32x512xf32>
    %19 = arith.mulf %0, %18 : vector<32x512xf32>
    %cst_5 = arith.constant 0.47942555 : f32
    %20 = vector.broadcast %cst_5 : f32 to vector<32x512xf32>
    %21 = arith.mulf %17, %20 : vector<32x512xf32>
    %22 = arith.subf %19, %21 : vector<32x512xf32>
    %23 = arith.select %11, %22, %0 : vector<32x512xi1>, vector<32x512xf32>
    %cst_6 = arith.constant 6.400000e+01 : f32
    %24 = vector.broadcast %cst_6 : f32 to vector<32x512xf32>
    %25 = arith.mulf %23, %24 : vector<32x512xf32>
    %c0_7 = arith.constant 0 : index
    %c0_8 = arith.constant 0 : index
    %26 = vector.load %arg4[%c0_7, %c0_8] : memref<32x512xf32, #tpu.memory_space<vmem>>, vector<32x512xf32>
    tpu.vector_store %arg4[%c0_7, %c0_8], %25 {strides = array<i32>} : memref<32x512xf32, #tpu.memory_space<vmem>>, vector<32x512xf32>,
    return
  }
  func.func @transform_0(%arg0: i32, %arg1: i32) -> (i32, i32) {
    %c0_i32 = arith.constant 0 : i32
    %c0_i32_0 = arith.constant 0 : i32
    return %arg0, %c0_i32 : i32, i32
  }
  func.func @transform_1(%arg0: i32, %arg1: i32) -> (i32, i32) {
    %c0_i32 = arith.constant 0 : i32
    return %arg0, %arg1 : i32, i32
  }
  func.func @transform_2(%arg0: i32, %arg1: i32) -> (i32, i32) {
    %c0_i32 = arith.constant 0 : i32
    return %arg0, %arg1 : i32, i32
  }
}

</mosaic_0001>

<bundles_post_ra>
// kernel: tpu_custom_call.1
= control target key start
LH: loop header
LB: loop body
LE: loop exit
PB: predicated region body
PF: predicated region fallthrough
CT: control target
= control target key end

     0   :  { %7 = vsyncpa [#allocation3], 0  ;;  %s1600_s0 = inlined_call_operand.vmem [shape: s32[32,1], index: 0, kind: input, shape index: {}]   ;;  %s1601_s1 = inlined_call_operand.hbm [shape: f32[32,1024], index: 1, kind: input, shape index: {}, may-alias: {1,2}]   ;;  %s1602_s2 = inlined_call_operand.hbm [shape: f32[32,1024], index: 2, kind: output, shape index: {}, may-alias: {1,2}]  }
   0x1   :  { %9 = vsyncpa [#allocation3 + $0x1], 0 }
   0x2   :  { %10 = vsyncpa [#allocation4], 0 }
   0x3   :  { %12 = vsyncpa [#allocation4 + $0x1], 0  ;;  %s937_s9 = smov 0   ;;  %s939_s10 = smov 0  }
   0x4   :  { %s941_s11 = smov 0   ;;  %s943_s12 = smov 0  }
   0x5   :  { %s945_s13 = smov 0   ;;  %s947_s14 = smov 0  }
   0x6 LB: > { %s681_s15 = sadd.s32 4294967295, %s911_s14   ;;  %s682_s16 = sadd.s32 4294967294, %s911_s14   ;;  %s911_s14 = sphi %s947_s14, %s18_s14   ;;  %s907_s13 = sphi %s945_s13, %s1645_s13   ;;  %s903_s12 = sphi %s943_s12, %s1644_s12   ;;  %s899_s11 = sphi %s941_s11, %s1643_s11   ;;  %s895_s10 = sphi %s939_s10, %s1642_s10   ;;  %s891_s9 = sphi %s937_s9, %s1641_s9  }
   0x7   : > { %s27_s17 = sadd.s32 1, %s907_s13  ;;  %s65_s18 = sadd.s32 1, %s899_s11 }
   0x8   : > { %p28_p0 = scmp.ge.s32.totalorder %s27_s17, 2  ;;  %p72_p1 = scmp.ne.s32.totalorder %s899_s11, %s895_s10 }
   0x9   : > { %p73_p2 = scmp.eq.s32.totalorder %s911_s14, 0  ;;  %p78_p3 = scmp.ne.s32.totalorder %s895_s10, %s891_s9 }
   0xa   : > { %s1647_s17 = smov (%p28_p0, %s27_s17), 0  ;;  %p79_p5 = scmp.eq.s32.totalorder %s681_s15, 0 }
   0xb   : > { %p978_p4 = por %p73_p2, %p72_p1  ;;  %s61_s20 = ssub.s32 %s907_s13, %s1647_s17 }
   0xc   : > { %p104_p6 = scmp.eq.s32.totalorder %s681_s15, 1  ;;  %p63_p7 = scmp.eq.s32.totalorder %s61_s20, 0 }
   0xd   : > { %p984_p8 = por %p79_p5, %p78_p3  ;;  %p110_p10 = scmp.eq.s32.totalorder %s682_s16, 1 }
   0xe   : > { %p988_p9 = por %p104_p6, %p72_p1  ;;  %p712_p13 = scmp.lt.s32.totalorder %s911_s14, 2 }
   0xf   : > { %s993_s23 = scalar_select %p63_p7, %s899_s11, %s65_s18  }
  0x10   : > { %p995_p11 = por %p110_p10, %p78_p3  ;;  %s139_s25 = sand.u32 1, %s899_s11  }
  0x11   : > { %s686_s26 = sshll.u32 %s139_s25, 7  ;;  %s698_s27 = sshll.u32 %s907_s13, 9 }
  0x12   : > { %s152_s30 = scalar_lea.hbm %s1601_s1, %s698_s27  ;;  %s143_s3 = scalar_lea.vmem [#allocation2], %s686_s26 }
  0x13   : > { %s153_s4 = sshll.u32 %s143_s3, 4  ;;  %p1008_p0 = pnand %p712_p13, %p978_p4  ;;  %s154_s4 = int_to_ptr.vmem [resolvable:$true] %s153_s4 }
  0x14   : > { %s140_s6 = scalar_lea.sflag [#allocation3], %s139_s25  ;;  %s816_s7 = scalar_lea.vmem %s154_s4, 2048 }
  0x15   : > { %p805_p1 = pneg %p1008_p0  ;;  %p817_p2 = scmp.ne.s32.totalorder %s154_s4, %s816_s7 }
  0x16   : > { %s913_s8 = smov [#allocation2]  }
  0x17   : > { %p819_p3 = pnand %p817_p2, %p805_p1  ;;  %s821_s15 = sshll.u32 %s913_s8, 4  ;;  %s822_s15 = int_to_ptr.vmem [resolvable:$false] %s821_s15 }
  0x18   : > { %s823_s16 = scalar_lea.vmem %s822_s15, 4096  ;;  %p824_p6 = scmp.lt.s32.totalorder %s154_s4, %s822_s15 }
  0x19   : > { %p820_p5 = pneg %p819_p3  ;;  %p825_p7 = scmp.lt.s32.totalorder %s823_s16, %s816_s7 }
  0x1b   : > { %p826_p10 = por %p825_p7, %p824_p6 }
  0x1d   : > { %p827_p12 = pnand %p826_p10, %p820_p5 }
  0x1f   : > { %830 = shalt.err (!%p827_p12)
}
  0x20   : > { %s914_s18 = smov 1024   ;;  %s915_s19 = smov 512  }
  0x21   : > { %s916_s20 = smov 32   ;;  %p689_p4 = scmp.ge.s32.totalorder %s911_s14, 1 }
  0x22   : > { %707 = dma.hbm_to_vmem [thread:$0]  (!%p1008_p0), %s152_s30, 2048, %s154_s4, %s140_s6, %s914_s18, %s915_s19, %s916_s20  }
  0x23   : > { %p161_p13 = scmp.lt.s32.totalorder %s911_s14, 3 }
  0x25   : > { %p162_p1 = pnand %p689_p4, %p161_p13 }
  0x27   : > { %165 = sbr.rel (%p162_p1) target bundleno = 218 (0xda), region = 28 }
  0x2c   : > { %s1019_s25 = sand.u32 1, %s895_s10  }
  0x2d   : > { %s690_s26 = sshll.u32 %s1019_s25, 7  ;;  %s168_s27 = scalar_lea.sflag [#allocation3], %s1019_s25 }
  0x2e   : > { %s1025_s28 = scalar_lea.vmem [#allocation2], %s690_s26 }
  0x2f   : > { %882 = dma.done.wait (%p984_p8), %s168_s27, 2048  }
  0x30   : > { %884 = vsyncadd (%p984_p8), %s168_s27, 4294965248  ;;  %v917_v0 = vmov 0   ;;  %v225_v1 = vld [vmem:[%s1600_s0 + $0x10] sm:$0xff]  ;;  %v223_v2 = vld [vmem:[%s1600_s0] sm:$0xff]  ;;  %v227_v24 = vlaneseq  ;;  %s692_s8 = sshll.u32 %s903_s12, 9  ;;  %s1448_s15 = scalar_lea.vmem [#allocation5], %s690_s26 }
  0x31   : > { %770 = vset.pattern.permute.xlu1 %v917_v0  ;;  %769 = vset.pattern.permute.xlu0 %v917_v0  ;;  %v226_v3 = vld [vmem:[%s1600_s0 + $0x18] sm:$0xff]  ;;  %v224_v4 = vld [vmem:[%s1600_s0 + $0x8] sm:$0xff]  ;;  %vm266_vm0 = vcmp.ne.s32.totalorder %v223_v2, 4294967295  ;;  %vm268_vm2 = vcmp.ne.s32.totalorder %v225_v1, 4294967295  ;;  %v1044_v9 = vld [vmem:[%s1025_s28 + $0x20] sm:$0xff]  ;;  %v233_v45 = vstv %s692_s8  ;;  %s579_s16 = sshll.u32 %s1448_s15, 4  ;;  %s1542_s20 = scalar_lea.hbm %s1602_s2, %s692_s8  ;;  %s1549_s16 = int_to_ptr.vmem [resolvable:$true] %s579_s16 }
  0x32   : > { %245 = vperm.xlu1 %770, %v225_v1   ;;  %239 = vperm.xlu0 %769, %v223_v2   ;;  %vm267_vm1 = vcmp.ne.s32.totalorder %v224_v4, 4294967295  ;;  %v270_v6 = vsel %vm266_vm0, 1, %v917_v0  ;;  %vm269_vm3 = vcmp.ne.s32.totalorder %v226_v3, 4294967295  ;;  %v272_v8 = vsel %vm268_vm2, 1, %v917_v0  ;;  %v1047_v10 = vld [vmem:[%s1025_s28 + $0x28] sm:$0xff]  ;;  %v1052_v12 = vld [vmem:[%s1025_s28 + $0x30] sm:$0xff] }
  0x33   : > { %v271_v5 = vsel %vm267_vm1, 1, %v917_v0  ;;  %v273_v7 = vsel %vm269_vm3, 1, %v917_v0  ;;  %v310_v11 = vmul.f32 %v1044_v9, %v1044_v9  ;;  %v1055_v13 = vld [vmem:[%s1025_s28 + $0x38] sm:$0xff]  ;;  %v311_v14 = vmul.f32 %v1047_v10, %v1047_v10  ;;  %v1060_v15 = vld [vmem:[%s1025_s28] sm:$0xff]  ;;  %v1065_v18 = vld [vmem:[%s1025_s28 + $0x8] sm:$0xff]  ;;  %s563_s12 = scalar_lea.sflag [#allocation4], %s1019_s25 }
  0x34   : > { %v312_v16 = vmul.f32 %v1052_v12, %v1052_v12  ;;  %v313_v19 = vmul.f32 %v1055_v13, %v1055_v13  ;;  %v1070_v20 = vld [vmem:[%s1025_s28 + $0x10] sm:$0xff]  ;;  %v1073_v22 = vld [vmem:[%s1025_s28 + $0x18] sm:$0xff]  ;;  %v306_v23 = vmul.f32 %v1060_v15, %v1060_v15  ;;  %v307_v25 = vmul.f32 %v1065_v18, %v1065_v18  ;;  %v1086_v31 = vld [vmem:[%s1025_s28 + $0x60] sm:$0xff]  ;;  %s831_s26 = scalar_lea.vmem %s1549_s16, 2048  ;;  %s918_s27 = smov [#allocation5]  }
  0x35   : > { %v326_v17 = vsub.f32 1.0, %v310_v11  ;;  %v327_v21 = vsub.f32 1.0, %v311_v14  ;;  %1614 = vst [vmem:[#allocation8_spill] sm:$0xff] %v1073_v22  ;;  %v308_v28 = vmul.f32 %v1070_v20, %v1070_v20  ;;  %v309_v30 = vmul.f32 %v1073_v22, %v1073_v22  ;;  %1615 = vst [vmem:[#allocation9_spill] sm:$0xff] %v1086_v31  ;;  %v1091_v36 = vld [vmem:[%s1025_s28 + $0x68] sm:$0xff]  ;;  %v1105_v43 = vld [vmem:[%s1025_s28 + $0x70] sm:$0xff]  ;;  %p832_p8 = scmp.ne.s32.totalorder %s1549_s16, %s831_s26 }
  0x36   : > { %248 = vperm.xlu1 %770, %v226_v3   ;;  %242 = vperm.xlu0 %769, %v224_v4   ;;  %v328_v26 = vsub.f32 1.0, %v312_v16  ;;  %v329_v29 = vsub.f32 1.0, %v313_v19  ;;  %v322_v33 = vsub.f32 1.0, %v306_v23  ;;  %v228_v34 = vand.u32 127, %v227_v24  ;;  %1616 = vst [vmem:[#allocation10_spill] sm:$0xff] %v1091_v36  ;;  %v1114_v47 = vld [vmem:[%s1025_s28 + $0x78] sm:$0xff] }
  0x37   : > { %v1079_v27 = vmax.f32 %v326_v17, 0.0  ;;  %v1088_v32 = vmax.f32 %v327_v21, 0.0  ;;  %v323_v35 = vsub.f32 1.0, %v307_v25  ;;  %v324_v38 = vsub.f32 1.0, %v308_v28  ;;  %v1129_v57 = vld [vmem:[%s1025_s28 + $0x40] sm:$0xff]  ;;  %v1142_v63 = vld [vmem:[%s1025_s28 + $0x48] sm:$0xff]  ;;  %p833_p12 = pnand %p832_p8, %p988_p9 }
  0x38   : > { %v1094_v37 = vmax.f32 %v328_v26, 0.0  ;;  %v318_v39 = vmul.f32 %v1086_v31, %v1086_v31  ;;  %v1099_v40 = vmax.f32 %v329_v29, 0.0  ;;  %v325_v41 = vsub.f32 1.0, %v309_v30  ;;  %1617 = vst [vmem:[#allocation11_spill] sm:$0xff] %v1142_v63  ;;  %v1173_v19 = vld [vmem:[%s1025_s28 + $0x50] sm:$0xff]  ;;  %v1181_v23 = vld [vmem:[%s1025_s28 + $0x58] sm:$0xff] }
  0x39   : > { %771 = vrsqrt.f32 %v1079_v27  ;;  %v1102_v42 = vmax.f32 %v322_v33, 0.0  ;;  %v319_v44 = vmul.f32 %v1091_v36, %v1091_v36  ;;  %v1111_v46 = vmax.f32 %v323_v35, 0.0  ;;  %1618 = vst [vmem:[#allocation12_spill] sm:$0xff] %v1173_v19  ;;  %1619 = vst [vmem:[#allocation13_spill] sm:$0xff] %v1181_v23  ;;  %p834_p0 = pneg %p833_p12  ;;  %s835_s28 = sshll.u32 %s918_s27, 4  ;;  %s836_s28 = int_to_ptr.vmem [resolvable:$false] %s835_s28 }
  0x3a   : > { %278 = vperm.xlu1 %770, %v271_v5   ;;  %275 = vperm.xlu0 %769, %v270_v6   ;;  %773 = vrsqrt.f32 %v1088_v32  ;;  %v229_v48 = vadd.s32 128, %v228_v34  ;;  %v1117_v49 = vmax.f32 %v324_v38, 0.0  ;;  %v334_v50 = vsub.f32 1.0, %v318_v39  ;;  %s837_s29 = scalar_lea.vmem %s836_s28, 4096  ;;  %p838_p2 = scmp.lt.s32.totalorder %s1549_s16, %s836_s28 }
  0x3b   : > { %775 = vrsqrt.f32 %v1094_v37  ;;  %v230_v51 = vadd.s32 256, %v228_v34  ;;  %v1120_v52 = vmax.f32 %v325_v41, 0.0  ;;  %v320_v53 = vmul.f32 %v1105_v43, %v1105_v43  ;;  %p839_p3 = scmp.lt.s32.totalorder %s837_s29, %s831_s26 }
  0x3c   : > { %777 = vrsqrt.f32 %v1099_v40  ;;  %v321_v54 = vmul.f32 %v1114_v47, %v1114_v47  ;;  %v335_v55 = vsub.f32 1.0, %v319_v44  ;;  %v231_v56 = vadd.s32 384, %v228_v34 }
  0x3d   : > { %779 = vrsqrt.f32 %v1102_v42  ;;  %v1131_v58 = vadd.s32 %v233_v45, %v228_v34  ;;  %v1134_v59 = vmax.f32 %v334_v50, 0.0  ;;  %v1136_v60 = vadd.s32 %v233_v45, %v229_v48  ;;  %p840_p5 = por %p839_p3, %p838_p2 }
  0x3e   : > { %284 = vperm.xlu1 %770, %v273_v7   ;;  %281 = vperm.xlu0 %769, %v272_v8   ;;  %781 = vrsqrt.f32 %v1111_v46  ;;  %v1138_v61 = vadd.s32 %v233_v45, %v230_v51  ;;  %v336_v62 = vsub.f32 1.0, %v320_v53  ;;  %v1145_v0 = vmul.f32 0.87758255, %v1044_v9 }
  0x3f   : > { %783 = vrsqrt.f32 %v1117_v49  ;;  %v337_v1 = vsub.f32 1.0, %v321_v54  ;;  %v1147_v2 = vmax.f32 %v335_v55, 0.0  ;;  %v314_v3 = vmul.f32 %v1129_v57, %v1129_v57  ;;  %p841_p6 = pnand %p840_p5, %p834_p0 }
  0x40   : > { %785 = vrsqrt.f32 %v1120_v52  ;;  %v1151_v4 = vadd.s32 %v233_v45, %v231_v56  ;;  %v1154_v5 = vmul.f32 0.87758255, %v1047_v10  ;;  %v1157_v6 = vmul.f32 0.87758255, %v1052_v12 }
  0x41   : > { %v1160_v7 = vmul.f32 0.87758255, %v1055_v13  ;;  %vm384_vm4 = vcmp.eq.f32.partialorder %v1079_v27, inf  ;;  %vm386_vm5 = vcmp.eq.f32.partialorder %v1079_v27, 0.0  ;;  %787 = vrsqrt.f32 %v1134_v59 }
  0x42   : > { %v315_v8 = vmul.f32 %v1142_v63, %v1142_v63  ;;  %v387_v14 = vand.u32 2147483648, %v1079_v27  ;;  %vm391_vm6 = vcmp.eq.f32.partialorder %v1088_v32, inf  ;;  %v1170_v17 = vmax.f32 %v336_v62, 0.0 }
  0x43   : > { %vm393_vm7 = vcmp.eq.f32.partialorder %v1088_v32, 0.0  ;;  %vm398_vm8 = vcmp.eq.f32.partialorder %v1094_v37, inf  ;;  %v1177_v21 = vmax.f32 %v337_v1, 0.0  ;;  %789 = vrsqrt.f32 %v1147_v2 }
  0x44   : > { %v330_v24 = vsub.f32 1.0, %v314_v3  ;;  %v401_v26 = vand.u32 2147483648, %v1094_v37  ;;  %vm405_vm9 = vcmp.eq.f32.partialorder %v1099_v40, inf  ;;  %v1187_v29 = vmul.f32 0.87758255, %v1060_v15 }
  0x45   : > { %vm400_vm10 = vcmp.eq.f32.partialorder %v1094_v37, 0.0  ;;  %v1192_v33 = vmul.f32 0.87758255, %v1065_v18  ;;  %v316_v34 = vmul.f32 %v1173_v19, %v1173_v19  ;;  %v331_v35 = vsub.f32 1.0, %v315_v8 }
  0x46   : > { %v772_v11 = vpop.eup %771  ;;  %vm356_vm11 = vcmp.eq.f32.partialorder %v1102_v42, inf  ;;  %v1198_v39 = vmul.f32 0.87758255, %v1070_v20  ;;  %791 = vrsqrt.f32 %v1170_v17  ;;  %v317_v41 = vmul.f32 %v1181_v23, %v1181_v23 }
  0x47   : > { %v774_v25 = vpop.eup %773  ;;  %v383_v30 = vmul.f32 %v772_v11, %v1079_v27  ;;  %vm407_vm12 = vcmp.eq.f32.partialorder %v1099_v40, 0.0  ;;  %v359_v48 = vand.u32 2147483648, %v1102_v42  ;;  %793 = vrsqrt.f32 %v1177_v21 }
  0x48   : > { %v776_v38 = vpop.eup %775  ;;  %v390_v45 = vmul.f32 %v774_v25, %v1088_v32  ;;  %v1207_v50 = vmax.f32 %v330_v24, 0.0  ;;  %vm358_vm13 = vcmp.eq.f32.partialorder %v1102_v42, 0.0  ;;  %vm363_vm14 = vcmp.eq.f32.partialorder %v1111_v46, inf }
  0x49   : > { %v778_v44 = vpop.eup %777  ;;  %v366_v53 = vand.u32 2147483648, %v1111_v46  ;;  %vm370_vm15 = vcmp.eq.f32.partialorder %v1117_v49, inf  ;;  %v373_v54 = vand.u32 2147483648, %v1117_v49  ;;  %v385_v56 = vsel %vm384_vm4, %v1079_v27, %v383_v30 }
  0x4a   : > { %v780_v51 = vpop.eup %779  ;;  %v397_v62 = vmul.f32 %v776_v38, %v1094_v37  ;;  %vm365_vm0 = vcmp.eq.f32.partialorder %v1111_v46, 0.0  ;;  %v332_v1 = vsub.f32 1.0, %v316_v34  ;;  %v1219_v3 = vmax.f32 %v331_v35, 0.0 }
  0x4b   : > { %v782_v55 = vpop.eup %781  ;;  %vm372_vm1 = vcmp.eq.f32.partialorder %v1117_v49, 0.0  ;;  %vm377_vm2 = vcmp.eq.f32.partialorder %v1120_v52, inf  ;;  %vm379_vm3 = vcmp.eq.f32.partialorder %v1120_v52, 0.0  ;;  %v380_v11 = vand.u32 2147483648, %v1120_v52 }
  0x4c   : > { %v784_v8 = vpop.eup %783  ;;  %v333_v24 = vsub.f32 1.0, %v317_v41  ;;  %v392_v30 = vsel %vm391_vm6, %v1088_v32, %v390_v45  ;;  %v404_v38 = vmul.f32 %v778_v44, %v1099_v40  ;;  %v1230_v34 = vmul.f32 0.87758255, %v1073_v22 }
  0x4d   : > { %v786_v25 = vpop.eup %785  ;;  %795 = vrsqrt.f32 %v1207_v50  ;;  %v388_v35 = vsel %vm386_vm5, %v387_v14, %v385_v56  ;;  %v355_v28 = vmul.f32 %v780_v51, %v1102_v42  ;;  %v1237_v16 = vmul.f32 0.87758255, %v1086_v31 }
  0x4e   : > { %v1240_v41 = vmul.f32 0.87758255, %v1091_v36  ;;  %v399_v44 = vsel %vm398_vm8, %v1094_v37, %v397_v62  ;;  %v362_v45 = vmul.f32 %v782_v55, %v1111_v46  ;;  %v1246_v22 = vmax.f32 %v332_v1, 0.0  ;;  %v788_v27 = vpop.eup %787 }
  0x4f   : > { %797 = vrsqrt.f32 %v1219_v3  ;;  %v1620_v14 = vand.u32 2147483648, %v1088_v32  ;;  %v369_v56 = vmul.f32 %v784_v8, %v1117_v49  ;;  %v376_v36 = vmul.f32 %v786_v25, %v1120_v52 }
  0x50   : > { %v1255_v31 = vmax.f32 %v333_v24, 0.0  ;;  %v406_v55 = vsel %vm405_vm9, %v1099_v40, %v404_v38  ;;  %vm440_vm4 = vcmp.eq.f32.partialorder %v1134_v59, inf  ;;  %v1262_v62 = vmul.f32 0.87758255, %v1105_v43  ;;  %v790_v32 = vpop.eup %789 }
  0x51   : > { %v395_v51 = vsel %vm393_vm7, %v1620_v14, %v392_v30  ;;  %v1265_v1 = vmul.f32 0.87758255, %v1114_v47  ;;  %v402_v8 = vsel %vm400_vm10, %v401_v26, %v399_v44  ;;  %v1269_v30 = vmul.f32 0.47942555, %v388_v35 }
  0x52   : > { %v357_v24 = vsel %vm356_vm11, %v1102_v42, %v355_v28  ;;  %vm442_vm5 = vcmp.eq.f32.partialorder %v1134_v59, 0.0  ;;  %v1275_v25 = vmul.f32 0.47942555, %v395_v51  ;;  %v364_v38 = vsel %vm363_vm14, %v1111_v46, %v362_v45 }
  0x53   : > { %v439_v14 = vmul.f32 %v788_v27, %v1134_v59  ;;  %799 = vrsqrt.f32 %v1246_v22  ;;  %v1621_v37 = vand.u32 2147483648, %v1099_v40  ;;  %v371_v28 = vsel %vm370_vm15, %v1117_v49, %v369_v56  ;;  %v792_v44 = vpop.eup %791 }
  0x54   : > { %v378_v35 = vsel %vm377_vm2, %v1120_v52, %v376_v36  ;;  %801 = vrsqrt.f32 %v1255_v31  ;;  %v360_v45 = vsel %vm358_vm13, %v359_v48, %v357_v24  ;;  %v443_v27 = vand.u32 2147483648, %v1134_v59  ;;  %v794_v40 = vpop.eup %793 }
  0x55   : > { %v409_v26 = vsel %vm407_vm12, %v1621_v37, %v406_v55  ;;  %v446_v51 = vmul.f32 %v790_v32, %v1147_v2  ;;  %vm447_vm6 = vcmp.eq.f32.partialorder %v1147_v2, inf  ;;  %v1298_v55 = vmul.f32 0.47942555, %v402_v8 }
  0x56   : > { %v367_v36 = vsel %vm365_vm0, %v366_v53, %v364_v38  ;;  %vm449_vm7 = vcmp.eq.f32.partialorder %v1147_v2, 0.0  ;;  %v1305_v37 = vmul.f32 0.47942555, %v409_v26  ;;  %v374_v42 = vsel %vm372_vm1, %v373_v54, %v371_v28 }
  0x57   : > { %v381_v48 = vsel %vm379_vm3, %v380_v11, %v378_v35  ;;  %v441_v32 = vsel %vm440_vm4, %v1134_v59, %v439_v14  ;;  %v1316_v24 = vmul.f32 0.47942555, %v360_v45  ;;  %v450_v46 = vand.u32 2147483648, %v1147_v2 }
  0x58   : > { %v453_v53 = vmul.f32 %v792_v44, %v1170_v17  ;;  %v1320_v38 = vmul.f32 0.47942555, %v367_v36  ;;  %v448_v49 = vsel %vm447_vm6, %v1147_v2, %v446_v51  ;;  %vm454_vm8 = vcmp.eq.f32.partialorder %v1170_v17, inf }
  0x59   : > { %v460_v52 = vmul.f32 %v794_v40, %v1177_v21  ;;  %v1325_v11 = vmul.f32 0.47942555, %v374_v42  ;;  %v1327_v14 = vmul.f32 0.47942555, %v381_v48  ;;  %v444_v26 = vsel %vm442_vm5, %v443_v27, %v441_v32 }
  0x5a   : > { %v796_v54 = vpop.eup %795  ;;  %vm461_vm9 = vcmp.eq.f32.partialorder %v1177_v21, inf  ;;  %vm456_vm10 = vcmp.eq.f32.partialorder %v1170_v17, 0.0  ;;  %v457_v44 = vand.u32 2147483648, %v1170_v17  ;;  %v451_v59 = vsel %vm449_vm7, %v450_v46, %v448_v49 }
  0x5b   : > { %v455_v27 = vsel %vm454_vm8, %v1170_v17, %v453_v53  ;;  %v464_v40 = vand.u32 2147483648, %v1177_v21  ;;  %v462_v48 = vsel %vm461_vm9, %v1177_v21, %v460_v52  ;;  %vm463_vm11 = vcmp.eq.f32.partialorder %v1177_v21, 0.0 }
  0x5c   : > { %v798_v45 = vpop.eup %797  ;;  %v1350_v32 = vmul.f32 0.47942555, %v444_v26  ;;  %v411_v35 = vmul.f32 %v796_v54, %v1207_v50  ;;  %vm412_vm12 = vcmp.eq.f32.partialorder %v1207_v50, inf  ;;  %v458_v49 = vsel %vm456_vm10, %v457_v44, %v455_v27 }
  0x5d   : > { %v1362_v52 = vmul.f32 0.47942555, %v451_v59  ;;  %v418_v21 = vmul.f32 %v798_v45, %v1219_v3  ;;  %v1366_v54 = vmul.f32 0.87758255, %v1129_v57  ;;  %v465_v2 = vsel %vm463_vm11, %v464_v40, %v462_v48 }
  0x5e   : > { %v415_v51 = vand.u32 2147483648, %v1207_v50  ;;  %vm419_vm13 = vcmp.eq.f32.partialorder %v1219_v3, inf  ;;  %v1371_v53 = vmul.f32 0.87758255, %v1142_v63  ;;  %v413_v45 = vsel %vm412_vm12, %v1207_v50, %v411_v35 }
  0x5f   : > { %vm414_vm14 = vcmp.eq.f32.partialorder %v1207_v50, 0.0  ;;  %v1380_v59 = vmul.f32 0.87758255, %v1173_v19  ;;  %v1382_v27 = vmul.f32 0.47942555, %v458_v49  ;;  %vm421_vm15 = vcmp.eq.f32.partialorder %v1219_v3, 0.0 }
  0x60   : > { %v800_v26 = vpop.eup %799  ;;  %v422_v40 = vand.u32 2147483648, %v1219_v3  ;;  %vm426_vm0 = vcmp.eq.f32.partialorder %v1246_v22, inf  ;;  %v1387_v48 = vmul.f32 0.47942555, %v465_v2  ;;  %v420_v35 = vsel %vm419_vm13, %v1219_v3, %v418_v21 }
  0x61   : > { %v802_v46 = vpop.eup %801  ;;  %v425_v50 = vmul.f32 %v800_v26, %v1246_v22  ;;  %v416_v8 = vsel %vm414_vm14, %v415_v51, %v413_v45  ;;  %vm428_vm1 = vcmp.eq.f32.partialorder %v1246_v22, 0.0  ;;  %v429_v49 = vand.u32 2147483648, %v1246_v22 }
  0x62   : > { %v432_v56 = vmul.f32 %v802_v46, %v1255_v31  ;;  %vm433_vm2 = vcmp.eq.f32.partialorder %v1255_v31, inf  ;;  %vm435_vm3 = vcmp.eq.f32.partialorder %v1255_v31, 0.0  ;;  %v436_v2 = vand.u32 2147483648, %v1255_v31 }
  0x63   : > { %v1400_v44 = vmul.f32 0.87758255, %v1181_v23  ;;  %v423_v46 = vsel %vm421_vm15, %v422_v40, %v420_v35  ;;  %v427_v26 = vsel %vm426_vm0, %v1246_v22, %v425_v50  ;;  %v1414_v45 = vmul.f32 0.47942555, %v416_v8 }
  0x64   : > { %v1622_v3 = vsub.f32 %v1145_v0, %v1269_v30  ;;  %v434_v35 = vsel %vm433_vm2, %v1255_v31, %v432_v56  ;;  %v1623_v8 = vsub.f32 %v1154_v5, %v1275_v25  ;;  %v1431_v23 = vmul.f32 0.47942555, %v423_v46 }
  0x65   : > { %v430_v56 = vsel %vm428_vm1, %v429_v49, %v427_v26  ;;  %v1627_v31 = vsub.f32 %v1192_v33, %v1320_v38  ;;  %v1629_v33 = vld [vmem:[#allocation8_spill] sm:$0xff]  ;;  %v1630_v38 = vsub.f32 %v1230_v34, %v1327_v14  ;;  %v1632_v34 = vsub.f32 %v1237_v16, %v1350_v32  ;;  %v1633_v14 = vld [vmem:[#allocation10_spill] sm:$0xff] }
  0x66   : > { %v507_v46 = vsub.f32 %v1371_v53, %v1431_v23  ;;  %v1635_v16 = vsub.f32 %v1262_v62, %v1382_v27  ;;  %v1636_v23 = vsub.f32 %v1265_v1, %v1387_v48 }
  0xad   : > { %v1344_v36 = vpop.permute.xlu1 %245  ;;  %v1346_v42 = vpop.permute.xlu0 %239 }
  0xae   : > { %vm250_vm14 = vcmp.eq.s32.totalorder %v1131_v58, %v1346_v42  ;;  %vm251_vm15 = vcmp.eq.s32.totalorder %v1136_v60, %v1346_v42  ;;  %vm252_vm1 = vcmp.eq.s32.totalorder %v1138_v61, %v1346_v42 }
  0xb1   : > { %v1373_v28 = vpop.permute.xlu1 %248  ;;  %v243_v17 = vpop.permute.xlu0 %242 }
  0xb2   : > { %vm254_vm4 = vcmp.eq.s32.totalorder %v1131_v58, %v243_v17  ;;  %vm255_vm6 = vcmp.eq.s32.totalorder %v1136_v60, %v243_v17  ;;  %vm256_vm8 = vcmp.eq.s32.totalorder %v1138_v61, %v243_v17  ;;  %vm257_vm11 = vcmp.eq.s32.totalorder %v1151_v4, %v243_v17 }
  0xb3   : > { %v1634_v17 = vsub.f32 %v1240_v41, %v1362_v52 }
  0xb5   : > { %v279_v19 = vpop.permute.xlu1 %278  ;;  %v276_v63 = vpop.permute.xlu0 %275 }
  0xb6   : > { %vm287_vm5 = vcmp.eq.s32.totalorder %v279_v19, 1  ;;  %vm286_vm10 = vcmp.eq.s32.totalorder %v276_v63, 1 }
  0xb7   : > { %vm294_vm7 = vmand %vm254_vm4, %vm287_vm5 }
  0xb8   : > { %vm295_vm9 = vmand %vm255_vm6, %vm287_vm5  ;;  %v518_v40 = vsel %vm294_vm7, %v1622_v3, %v1044_v9  ;;  %v1624_v9 = vsub.f32 %v1157_v6, %v1298_v55  ;;  %vm262_vm7 = vcmp.eq.s32.totalorder %v1131_v58, %v1373_v28 }
  0xb9   : > { %vm296_vm12 = vmand %vm256_vm8, %vm287_vm5  ;;  %v519_v50 = vsel %vm295_vm9, %v1623_v8, %v1047_v10  ;;  %v534_v21 = vmul.f32 64.0, %v518_v40  ;;  %v285_v51 = vpop.permute.xlu1 %284  ;;  %v1625_v10 = vsub.f32 %v1160_v7, %v1305_v37  ;;  %v282_v55 = vpop.permute.xlu0 %281  ;;  %vm263_vm8 = vcmp.eq.s32.totalorder %v1136_v60, %v1373_v28 }
  0xba   : > { %vm297_vm13 = vmand %vm257_vm11, %vm287_vm5  ;;  %v520_v0 = vsel %vm296_vm12, %v1624_v9, %v1052_v12  ;;  %v535_v30 = vmul.f32 64.0, %v519_v50  ;;  %v437_v12 = vsel %vm435_vm3, %v436_v2, %v434_v35  ;;  %vm289_vm4 = vcmp.eq.s32.totalorder %v285_v51, 1 }
  0xbb   : > { %v521_v5 = vsel %vm297_vm13, %v1625_v10, %v1055_v13  ;;  %v536_v25 = vmul.f32 64.0, %v520_v0  ;;  %550 = vst [vmem:[%s1448_s15 + $0x20] sm:$0xff] %v534_v21  ;;  %vm290_vm0 = vmand %vm250_vm14, %vm286_vm10  ;;  %v1626_v13 = vsub.f32 %v1187_v29, %v1316_v24  ;;  %vm253_vm5 = vcmp.eq.s32.totalorder %v1151_v4, %v1346_v42 }
  0xbc   : > { %v537_v22 = vmul.f32 64.0, %v521_v5  ;;  %551 = vst [vmem:[%s1448_s15 + $0x28] sm:$0xff] %v535_v30  ;;  %vm291_vm2 = vmand %vm251_vm15, %vm286_vm10  ;;  %v506_v29 = vsub.f32 %v1366_v54, %v1414_v45  ;;  %vm288_vm12 = vcmp.eq.s32.totalorder %v282_v55, 1  ;;  %vm265_vm13 = vcmp.eq.s32.totalorder %v1151_v4, %v1373_v28 }
  0xbd   : > { %v514_v6 = vsel %vm290_vm0, %v1626_v13, %v1060_v15  ;;  %552 = vst [vmem:[%s1448_s15 + $0x30] sm:$0xff] %v536_v25  ;;  %vm292_vm3 = vmand %vm252_vm1, %vm286_vm10  ;;  %v515_v7 = vsel %vm291_vm2, %v1627_v31, %v1065_v18  ;;  %v1628_v15 = vsub.f32 %v1198_v39, %v1325_v11  ;;  %v492_v18 = vmul.f32 0.47942555, %v430_v56  ;;  %v1631_v39 = vld [vmem:[#allocation9_spill] sm:$0xff] }
  0xbe   : > { %v530_v19 = vmul.f32 64.0, %v514_v6  ;;  %553 = vst [vmem:[%s1448_s15 + $0x38] sm:$0xff] %v537_v22  ;;  %vm293_vm6 = vmand %vm253_vm5, %vm286_vm10  ;;  %v531_v24 = vmul.f32 64.0, %v515_v7  ;;  %vm264_vm10 = vcmp.eq.s32.totalorder %v1138_v61, %v1373_v28  ;;  %vm258_vm0 = vcmp.eq.s32.totalorder %v1131_v58, %v1344_v36  ;;  %v1637_v58 = vld [vmem:[#allocation11_spill] sm:$0xff] }
  0xbf   : > { %v516_v37 = vsel %vm292_vm3, %v1628_v15, %v1070_v20  ;;  %v517_v42 = vsel %vm293_vm6, %v1630_v38, %v1629_v33  ;;  %vm302_vm9 = vmand %vm262_vm7, %vm289_vm4  ;;  %v493_v20 = vmul.f32 0.47942555, %v437_v12  ;;  %v508_v41 = vsub.f32 %v1380_v59, %v492_v18 }
  0xc0   : > { %v532_v54 = vmul.f32 64.0, %v516_v37  ;;  %546 = vst [vmem:[%s1448_s15] sm:$0xff] %v530_v19  ;;  %v533_v63 = vmul.f32 64.0, %v517_v42  ;;  %547 = vst [vmem:[%s1448_s15 + $0x8] sm:$0xff] %v531_v24  ;;  %v526_v11 = vsel %vm302_vm9, %v1632_v34, %v1631_v39  ;;  %vm259_vm1 = vcmp.eq.s32.totalorder %v1136_v60, %v1344_v36 }
  0xc1   : > { %vm303_vm11 = vmand %vm263_vm8, %vm289_vm4  ;;  %v542_v2 = vmul.f32 64.0, %v526_v11  ;;  %vm261_vm3 = vcmp.eq.s32.totalorder %v1151_v4, %v1344_v36 }
  0xc2   : > { %548 = vst [vmem:[%s1448_s15 + $0x10] sm:$0xff] %v532_v54  ;;  %vm304_vm14 = vmand %vm264_vm10, %vm289_vm4  ;;  %v527_v49 = vsel %vm303_vm11, %v1634_v17, %v1633_v14 }
  0xc3   : > { %549 = vst [vmem:[%s1448_s15 + $0x18] sm:$0xff] %v533_v63  ;;  %vm305_vm15 = vmand %vm265_vm13, %vm289_vm4  ;;  %v528_v28 = vsel %vm304_vm14, %v1635_v16, %v1105_v43  ;;  %v543_v32 = vmul.f32 64.0, %v527_v49  ;;  %v509_v43 = vsub.f32 %v1400_v44, %v493_v20  ;;  %vm260_vm4 = vcmp.eq.s32.totalorder %v1138_v61, %v1344_v36  ;;  %v1639_v36 = vld [vmem:[#allocation13_spill] sm:$0xff] }
  0xc4   : > { %v529_v53 = vsel %vm305_vm15, %v1636_v23, %v1114_v47  ;;  %v544_v52 = vmul.f32 64.0, %v528_v28  ;;  %558 = vst [vmem:[%s1448_s15 + $0x60] sm:$0xff] %v542_v2  ;;  %vm298_vm2 = vmand %vm258_vm0, %vm288_vm12 }
  0xc5   : > { %v545_v62 = vmul.f32 64.0, %v529_v53  ;;  %559 = vst [vmem:[%s1448_s15 + $0x68] sm:$0xff] %v543_v32  ;;  %vm299_vm5 = vmand %vm259_vm1, %vm288_vm12  ;;  %v522_v47 = vsel %vm298_vm2, %v506_v29, %v1129_v57  ;;  %v1638_v57 = vld [vmem:[#allocation12_spill] sm:$0xff] }
  0xc6   : > { %560 = vst [vmem:[%s1448_s15 + $0x70] sm:$0xff] %v544_v52  ;;  %vm300_vm6 = vmand %vm260_vm4, %vm288_vm12  ;;  %v523_v60 = vsel %vm299_vm5, %v507_v46, %v1637_v58  ;;  %v538_v1 = vmul.f32 64.0, %v522_v47 }
  0xc7   : > { %561 = vst [vmem:[%s1448_s15 + $0x78] sm:$0xff] %v545_v62  ;;  %vm301_vm7 = vmand %vm261_vm3, %vm288_vm12  ;;  %v524_v61 = vsel %vm300_vm6, %v508_v41, %v1638_v57  ;;  %v539_v4 = vmul.f32 64.0, %v523_v60 }
  0xc8   : > { %v525_v44 = vsel %vm301_vm7, %v509_v43, %v1639_v36  ;;  %v540_v59 = vmul.f32 64.0, %v524_v61  ;;  %554 = vst [vmem:[%s1448_s15 + $0x40] sm:$0xff] %v538_v1 }
  0xc9   : > { %v541_v27 = vmul.f32 64.0, %v525_v44  ;;  %555 = vst [vmem:[%s1448_s15 + $0x48] sm:$0xff] %v539_v4 }
  0xca   : > { %556 = vst [vmem:[%s1448_s15 + $0x50] sm:$0xff] %v540_v59 }
  0xcb   : > { %557 = vst [vmem:[%s1448_s15 + $0x58] sm:$0xff] %v541_v27 }
  0xcc   : > { %844 = shalt.err (!%p841_p6)
}
  0xcd   : > { %s845_s30 = scalar_lea.hbm %s1542_s20, 2048  ;;  %s849_s5 = scalar_lea.hbm %s1602_s2, 4096 }
  0xce   : > { %p846_p7 = scmp.ne.s32.totalorder %s1542_s20, %s845_s30  ;;  %p850_p13 = scmp.lt.s32.totalorder %s1542_s20, %s1602_s2 }
  0xcf   : > { %p851_p1 = scmp.lt.s32.totalorder %s849_s5, %s845_s30 }
  0xd0   : > { %p847_p10 = pnand %p846_p7, %p988_p9 }
  0xd1   : > { %p852_p8 = por %p851_p1, %p850_p13 }
  0xd2   : > { %p848_p4 = pneg %p847_p10 }
  0xd4   : > { %p853_p12 = pnand %p852_p8, %p848_p4 }
  0xd6   : > { %856 = shalt.err (!%p853_p12)
}
  0xd7   : > { %s919_s21 = smov 512   ;;  %s920_s8 = smov 1024  }
  0xd8   : > { %s921_s15 = smov 32  }
  0xd9   : > { %702 = dma.vmem_to_hbm [thread:$0]  (%p988_p9), %s1549_s16, 2048, %s1542_s20, %s563_s12, %s919_s21, %s920_s8, %s921_s15  }
  0xda PF: > { %s594_s18 = sand.u32 1, %s891_s9   ;;  %p1640_p0 = scmp.ge.s32.totalorder %s911_s14, 2 }
  0xdb   : > { %s595_s19 = scalar_lea.sflag [#allocation4], %s594_s18 }
  0xdc   : > { %p709_p2 = pnand %p1640_p0, %p995_p11 }
  0xde   : > { %p710_p3 = pneg %p709_p2 }
  0xe0   : > { %886 = dma.done.wait (%p710_p3), %s595_s19, 2048  }
  0xe1   : > { %888 = vsyncadd (%p710_p3), %s595_s19, 4294965248  ;;  %s18_s14 = sadd.s32 1, %s911_s14   ;;  %s1641_s9 = smov %s895_s10 }
  0xe2   : > { %p15_p5 = scmp.ge.s32.totalorder %s18_s14, 4   ;;  %s1642_s10 = smov %s899_s11 }
  0xe3   : > { %s1643_s11 = smov %s993_s23  ;;  %s1644_s12 = smov %s907_s13 }
  0xe4   : > { %s1645_s13 = smov %s1647_s17  ;;  %17 = sbr.rel (!%p15_p5) target bundleno = 6 (0x6), region = 76 }
  0xe9   :  { %600 = vsyncpa [#allocation3], 1 }
  0xea   :  { %602 = vsyncpa [#allocation3 + $0x1], 1 }
  0xeb   :  { %603 = vsyncpa [#allocation4], 1 }
  0xec   :  { %605 = vsyncpa [#allocation4 + $0x1], 1 }

</bundles_post_ra>
